<compile_context>
chip_gen: v5e
topology: v5e:2x2
jax: 0.10.0
libtpu: 0.0.40
codegen_flags: <defaults>
</compile_context>

<pallas_src>
import functools

import jax
import jax.numpy as jnp
from jax.experimental import pallas as pl
from jax.experimental.pallas import tpu as pltpu

LANE = 128  # TPU lane width


def _round_up(n, m):
    return ((n + m - 1) // m) * m


def _cdiv(a, b):
    return -(-a // b)


def _default_batch_tile():
    # v5e's MXU M is 128 (vs 256 on v6e/v7x) -> smaller default tile there.
    try:
        kind = jax.devices()[0].device_kind.lower()
        if "v5 lite" in kind or "v5e" in kind:
            return 128
    except Exception:
        pass
    return 256


def _choose_batch_tiling(B, max_tile):
    """Minimal-padding batch tiling; even tile count when multi-tile (v7x TCs)."""
    n_tiles = _cdiv(B, max_tile)
    if n_tiles > 1 and n_tiles % 2:
        n_tiles += 1
    TB = _round_up(_cdiv(B, n_tiles), 16)  # multiple of 16 satisfies the (8,128) rule
    return TB, TB * n_tiles, n_tiles


def actor_kernel(x_ref, w1_ref, b1_ref, w2_ref, b2_ref, w3_ref, b3_ref, o_ref):
    # x tile: (TB, S) f32 -> cast to bf16 in-kernel (MXU operands bf16, f32 acc).
    x = x_ref[...].astype(jnp.bfloat16)

    # Layer 1: Linear + bias + ReLU (bias/ReLU in f32 on the VPU).
    h1 = jnp.dot(x, w1_ref[...], preferred_element_type=jnp.float32) + b1_ref[...]
    h1 = jnp.maximum(h1, 0.0).astype(jnp.bfloat16)

    # Layer 2: Linear + bias + ReLU.
    h2 = jnp.dot(h1, w2_ref[...], preferred_element_type=jnp.float32) + b2_ref[...]
    h2 = jnp.maximum(h2, 0.0).astype(jnp.bfloat16)

    # Layer 3: Linear -> logits over a lane-dense (128-wide) padded action dim.
    # Padded lanes carry bias = -1e30 -> exp underflows to exactly 0.
    logits = jnp.dot(h2, w3_ref[...], preferred_element_type=jnp.float32) + b3_ref[...]

    # Numerically stable softmax with an exact divide (probs may feed sampling).
    m = jnp.max(logits, axis=-1, keepdims=True)
    e = jnp.exp(logits - m)
    denom = jnp.sum(e, axis=-1, keepdims=True)
    o_ref[...] = (e / denom).astype(o_ref.dtype)


def prepare_params(params):
    """One-time model prep: bf16 matmul weights + lane-dense (128-wide) layer 3.

    Returns (kernel_params, action_dim)."""
    w1, b1, w2, b2, w3, b3 = params
    A = w3.shape[1]
    Ap = _round_up(A, LANE)
    if Ap != A:
        w3 = jnp.pad(w3, ((0, 0), (0, Ap - A)))                          # zero weight cols
        b3 = jnp.pad(b3, ((0, 0), (0, Ap - A)), constant_values=-1e30)   # -inf-ish bias
    bf = jnp.bfloat16
    kernel_params = (w1.astype(bf), b1, w2.astype(bf), b2, w3.astype(bf), b3)
    return kernel_params, A


@functools.partial(jax.jit, static_argnames=("action_dim", "batch_tile"))
def actor_forward(x, kernel_params, *, action_dim, batch_tile=None):
    """x: (B, state_dim) f32. kernel_params from prepare_params().
    Returns (B, action_dim) f32 action probabilities."""
    w1, b1, w2, b2, w3, b3 = kernel_params
    B, S = x.shape
    Ap = w3.shape[1]  # lane-dense padded action dim (multiple of 128)

    if batch_tile is None:
        batch_tile = _default_batch_tile()
    TB, Bp, n_tiles = _choose_batch_tiling(B, batch_tile)
    if Bp != B:
        # Zero-padded rows flow through ReLU/softmax harmlessly; sliced off below.
        x = jnp.pad(x, ((0, Bp - B), (0, 0)))

    resident = lambda shape: pl.BlockSpec(shape, lambda i: (0, 0))  # VMEM-resident across steps

    out = pl.pallas_call(
        actor_kernel,
        out_shape=jax.ShapeDtypeStruct((Bp, Ap), jnp.float32),
        grid_spec=pltpu.PrefetchScalarGridSpec(
            num_scalar_prefetch=0,
            grid=(n_tiles,),
            in_specs=[
                pl.BlockSpec((TB, S), lambda i: (i, 0)),  # x tiled over batch
                resident(w1.shape), resident(b1.shape),
                resident(w2.shape), resident(b2.shape),
                resident(w3.shape), resident(b3.shape),
            ],
            out_specs=pl.BlockSpec((TB, Ap), lambda i: (i, 0)),  # lane-dense unmasked stores
        ),
        compiler_params=pltpu.CompilerParams(
            dimension_semantics=("parallel",),  # batch tiles shard across TCs on v7x
        ),
    )(x, w1, b1, w2, b2, w3, b3)

    return out[:B, :action_dim]


def init_params(key, state_dim, action_dim, hidden_size=128):
    """Deterministic init mimicking PyTorch nn.Linear (U(-1/sqrt(fan_in), ...))."""
    def linear(k, fan_in, fan_out):
        kw, kb = jax.random.split(k)
        bound = 1.0 / jnp.sqrt(fan_in)
        w = jax.random.uniform(kw, (fan_in, fan_out), jnp.float32, -bound, bound)
        b = jax.random.uniform(kb, (1, fan_out), jnp.float32, -bound, bound)
        return w, b

    k1, k2, k3 = jax.random.split(key, 3)
    w1, b1 = linear(k1, state_dim, hidden_size)
    w2, b2 = linear(k2, hidden_size, hidden_size)
    w3, b3 = linear(k3, hidden_size, action_dim)
    return (w1, b1, w2, b2, w3, b3)


def reference_forward_f32(x, params):
    w1, b1, w2, b2, w3, b3 = params
    h1 = jax.nn.relu(x @ w1 + b1)
    h2 = jax.nn.relu(h1 @ w2 + b2)
    return jax.nn.softmax(h2 @ w3 + b3, axis=-1)


def reference_forward_bf16(x, params):
    """Pure-JAX reference with the same bf16-operand / f32-accumulate matmuls."""
    w1, b1, w2, b2, w3, b3 = params
    bf = jnp.bfloat16
    h1 = jnp.maximum(jnp.dot(x.astype(bf), w1.astype(bf), preferred_element_type=jnp.float32) + b1, 0.0)
    h2 = jnp.maximum(jnp.dot(h1.astype(bf), w2.astype(bf), preferred_element_type=jnp.float32) + b2, 0.0)
    logits = jnp.dot(h2.astype(bf), w3.astype(bf), preferred_element_type=jnp.float32) + b3
    return jax.nn.softmax(logits, axis=-1)


if __name__ == "__main__":
    state_dim, action_dim, hidden_size = 32, 8, 128

    key = jax.random.PRNGKey(0)
    kx, kp = jax.random.split(key)
    params = init_params(kp, state_dim, action_dim, hidden_size)
    kernel_params, A = prepare_params(params)   # bf16 cast + lane padding, once

    # Two regimes: tiny latency-bound batch (1 tile of 16), and a multi-tile
    # batch exercising the minimal-padding / even-tile path (300 -> 2 x 160).
    for batch in (8, 300):
        x = jax.random.normal(jax.random.fold_in(kx, batch), (batch, state_dim), jnp.float32)

        out = jax.block_until_ready(actor_forward(x, kernel_params, action_dim=A))

        assert out.shape == (batch, action_dim)
        # Exact softmax divide -> row sums are ~1 to f32 rounding.
        assert jnp.allclose(jnp.sum(out, axis=-1), 1.0, atol=1e-4)
        ref_bf16 = reference_forward_bf16(x, params)
        assert jnp.allclose(out, ref_bf16, atol=1e-2, rtol=1e-2)
        ref_f32 = reference_forward_f32(x, params)
        assert jnp.allclose(out, ref_f32, atol=5e-2, rtol=5e-2)

    print("KERNEL_OK")
</pallas_src>

<mosaic_0001>
module attributes {stable_mosaic.version = 11 : i64} {
  func.func @actor_kernel(%arg0: i32, %arg1: memref<16x32xf32, #tpu.memory_space<vmem>>, %arg2: memref<32x128xbf16, #tpu.memory_space<vmem>>, %arg3: memref<1x128xf32, #tpu.memory_space<vmem>>, %arg4: memref<128x128xbf16, #tpu.memory_space<vmem>>, %arg5: memref<1x128xf32, #tpu.memory_space<vmem>>, %arg6: memref<128x128xbf16, #tpu.memory_space<vmem>>, %arg7: memref<1x128xf32, #tpu.memory_space<vmem>>, %arg8: memref<16x128xf32, #tpu.memory_space<vmem>>) attributes {dimension_semantics = [#tpu.dimension_semantics<parallel>], iteration_bounds = array<i64: 1>, scalar_prefetch = 0 : i64, scratch_operands = 0 : i64, tpu.core_type = #tpu.core_type<tc>, window_params = [{transform_indices = @transform_0, window_bounds = array<i64: 16, 32>}, {pipeline_mode = #tpu.pipeline_mode<synchronous>, transform_indices = @transform_1, window_bounds = array<i64: 32, 128>}, {pipeline_mode = #tpu.pipeline_mode<synchronous>, transform_indices = @transform_2, window_bounds = array<i64: 1, 128>}, {pipeline_mode = #tpu.pipeline_mode<synchronous>, transform_indices = @transform_3, window_bounds = array<i64: 128, 128>}, {pipeline_mode = #tpu.pipeline_mode<synchronous>, transform_indices = @transform_4, window_bounds = array<i64: 1, 128>}, {pipeline_mode = #tpu.pipeline_mode<synchronous>, transform_indices = @transform_5, window_bounds = array<i64: 128, 128>}, {pipeline_mode = #tpu.pipeline_mode<synchronous>, transform_indices = @transform_6, window_bounds = array<i64: 1, 128>}, {transform_indices = @transform_7, window_bounds = array<i64: 16, 128>}]} {
    %c0 = arith.constant 0 : index
    %c0_0 = arith.constant 0 : index
    %0 = vector.load %arg1[%c0, %c0_0] : memref<16x32xf32, #tpu.memory_space<vmem>>, vector<16x32xf32>
    %1 = arith.truncf %0 : vector<16x32xf32> to vector<16x32xbf16>
    %c0_1 = arith.constant 0 : index
    %c0_2 = arith.constant 0 : index
    %2 = vector.load %arg2[%c0_1, %c0_2] : memref<32x128xbf16, #tpu.memory_space<vmem>>, vector<32x128xbf16>
    %cst = arith.constant dense<0.000000e+00> : vector<16x128xf32>
    %3 = tpu.matmul %1, %2, %cst {dimension_numbers = #tpu.dot_dimension_numbers<[1], [0], [0], [1], [0, 0, 1, 1], [], []>} : vector<16x32xbf16>, vector<32x128xbf16>, vector<16x128xf32> -> vector<16x128xf32>
    %c0_3 = arith.constant 0 : index
    %c0_4 = arith.constant 0 : index
    %4 = vector.load %arg3[%c0_3, %c0_4] : memref<1x128xf32, #tpu.memory_space<vmem>>, vector<1x128xf32>
    %5 = vector.broadcast %4 : vector<1x128xf32> to vector<16x128xf32>
    %6 = arith.addf %3, %5 : vector<16x128xf32>
    %cst_5 = arith.constant 0.000000e+00 : f32
    %7 = vector.broadcast %cst_5 : f32 to vector<16x128xf32>
    %8 = arith.maximumf %6, %7 : vector<16x128xf32>
    %9 = arith.truncf %8 : vector<16x128xf32> to vector<16x128xbf16>
    %c0_6 = arith.constant 0 : index
    %c0_7 = arith.constant 0 : index
    %10 = vector.load %arg4[%c0_6, %c0_7] : memref<128x128xbf16, #tpu.memory_space<vmem>>, vector<128x128xbf16>
    %cst_8 = arith.constant dense<0.000000e+00> : vector<16x128xf32>
    %11 = tpu.matmul %9, %10, %cst_8 {dimension_numbers = #tpu.dot_dimension_numbers<[1], [0], [0], [1], [0, 0, 1, 1], [], []>} : vector<16x128xbf16>, vector<128x128xbf16>, vector<16x128xf32> -> vector<16x128xf32>
    %c0_9 = arith.constant 0 : index
    %c0_10 = arith.constant 0 : index
    %12 = vector.load %arg5[%c0_9, %c0_10] : memref<1x128xf32, #tpu.memory_space<vmem>>, vector<1x128xf32>
    %13 = vector.broadcast %12 : vector<1x128xf32> to vector<16x128xf32>
    %14 = arith.addf %11, %13 : vector<16x128xf32>
    %cst_11 = arith.constant 0.000000e+00 : f32
    %15 = vector.broadcast %cst_11 : f32 to vector<16x128xf32>
    %16 = arith.maximumf %14, %15 : vector<16x128xf32>
    %17 = arith.truncf %16 : vector<16x128xf32> to vector<16x128xbf16>
    %c0_12 = arith.constant 0 : index
    %c0_13 = arith.constant 0 : index
    %18 = vector.load %arg6[%c0_12, %c0_13] : memref<128x128xbf16, #tpu.memory_space<vmem>>, vector<128x128xbf16>
    %cst_14 = arith.constant dense<0.000000e+00> : vector<16x128xf32>
    %19 = tpu.matmul %17, %18, %cst_14 {dimension_numbers = #tpu.dot_dimension_numbers<[1], [0], [0], [1], [0, 0, 1, 1], [], []>} : vector<16x128xbf16>, vector<128x128xbf16>, vector<16x128xf32> -> vector<16x128xf32>
    %c0_15 = arith.constant 0 : index
    %c0_16 = arith.constant 0 : index
    %20 = vector.load %arg7[%c0_15, %c0_16] : memref<1x128xf32, #tpu.memory_space<vmem>>, vector<1x128xf32>
    %21 = vector.broadcast %20 : vector<1x128xf32> to vector<16x128xf32>
    %22 = arith.addf %19, %21 : vector<16x128xf32>
    %cst_17 = arith.constant dense<0xFF800000> : vector<16xf32>
    %23 = vector.multi_reduction <maximumf>, %22, %cst_17 [1] : vector<16x128xf32> to vector<16xf32>
    %24 = vector.shape_cast %23 : vector<16xf32> to vector<16x1xf32>
    %25 = vector.broadcast %24 : vector<16x1xf32> to vector<16x128xf32>
    %26 = arith.subf %22, %25 : vector<16x128xf32>
    %27 = math.exp %26 : vector<16x128xf32>
    %cst_18 = arith.constant dense<0.000000e+00> : vector<16xf32>
    %28 = vector.multi_reduction <add>, %27, %cst_18 [1] : vector<16x128xf32> to vector<16xf32>
    %29 = vector.shape_cast %28 : vector<16xf32> to vector<16x1xf32>
    %30 = vector.broadcast %29 : vector<16x1xf32> to vector<16x128xf32>
    %31 = arith.divf %27, %30 : vector<16x128xf32>
    %c0_19 = arith.constant 0 : index
    %c0_20 = arith.constant 0 : index
    %32 = vector.load %arg8[%c0_19, %c0_20] : memref<16x128xf32, #tpu.memory_space<vmem>>, vector<16x128xf32>
    tpu.vector_store %arg8[%c0_19, %c0_20], %31 {strides = array<i32>} : memref<16x128xf32, #tpu.memory_space<vmem>>, vector<16x128xf32>,
    return
  }
  func.func @transform_0(%arg0: i32) -> (i32, i32) {
    %c0_i32 = arith.constant 0 : i32
    %c0_i32_0 = arith.constant 0 : i32
    return %arg0, %c0_i32 : i32, i32
  }
  func.func @transform_1(%arg0: i32) -> (i32, i32) {
    %c0_i32 = arith.constant 0 : i32
    %c0_i32_0 = arith.constant 0 : i32
    %c0_i32_1 = arith.constant 0 : i32
    return %c0_i32, %c0_i32_0 : i32, i32
  }
  func.func @transform_2(%arg0: i32) -> (i32, i32) {
    %c0_i32 = arith.constant 0 : i32
    %c0_i32_0 = arith.constant 0 : i32
    %c0_i32_1 = arith.constant 0 : i32
    return %c0_i32, %c0_i32_0 : i32, i32
  }
  func.func @transform_3(%arg0: i32) -> (i32, i32) {
    %c0_i32 = arith.constant 0 : i32
    %c0_i32_0 = arith.constant 0 : i32
    %c0_i32_1 = arith.constant 0 : i32
    return %c0_i32, %c0_i32_0 : i32, i32
  }
  func.func @transform_4(%arg0: i32) -> (i32, i32) {
    %c0_i32 = arith.constant 0 : i32
    %c0_i32_0 = arith.constant 0 : i32
    %c0_i32_1 = arith.constant 0 : i32
    return %c0_i32, %c0_i32_0 : i32, i32
  }
  func.func @transform_5(%arg0: i32) -> (i32, i32) {
    %c0_i32 = arith.constant 0 : i32
    %c0_i32_0 = arith.constant 0 : i32
    %c0_i32_1 = arith.constant 0 : i32
    return %c0_i32, %c0_i32_0 : i32, i32
  }
  func.func @transform_6(%arg0: i32) -> (i32, i32) {
    %c0_i32 = arith.constant 0 : i32
    %c0_i32_0 = arith.constant 0 : i32
    %c0_i32_1 = arith.constant 0 : i32
    return %c0_i32, %c0_i32_0 : i32, i32
  }
  func.func @transform_7(%arg0: i32) -> (i32, i32) {
    %c0_i32 = arith.constant 0 : i32
    %c0_i32_0 = arith.constant 0 : i32
    return %arg0, %c0_i32 : i32, i32
  }
}

</mosaic_0001>

<bundles_post_ra>
// kernel: actor_forward.1
= control target key start
LH: loop header
LB: loop body
LE: loop exit
PB: predicated region body
PF: predicated region fallthrough
CT: control target
= control target key end

     0   :  { %12 = vsyncpa [#allocation3], 0  ;;  %s557_s0 = inlined_call_operand.vmem [shape: f32[16,32], index: 0, kind: input, shape index: {}]   ;;  %s558_s1 = inlined_call_operand.vmem [shape: bf16[32,128], index: 1, kind: input, shape index: {}]   ;;  %s559_s2 = inlined_call_operand.vmem [shape: f32[1,128], index: 2, kind: input, shape index: {}]   ;;  %s560_s3 = inlined_call_operand.hbm [shape: bf16[128,128], index: 3, kind: input, shape index: {}]   ;;  %s561_s4 = inlined_call_operand.vmem [shape: f32[1,128], index: 4, kind: input, shape index: {}]   ;;  %s562_s5 = inlined_call_operand.hbm [shape: bf16[128,128], index: 5, kind: input, shape index: {}]   ;;  %s563_s6 = inlined_call_operand.vmem [shape: f32[1,128], index: 6, kind: input, shape index: {}]   ;;  %s564_s7 = inlined_call_operand.vmem [shape: f32[16,128], index: 7, kind: output, shape index: {}]  }
   0x1   :  { %s24_s26 = sshll.u32 %s560_s3, 4  ;;  %s25_s26 = int_to_ptr.hbm [resolvable:$true] %s24_s26 }
   0x2   :  { %13 = vsyncpa [#allocation5], 0  ;;  %s480_s27 = smov [#allocation2]   ;;  %s39_s8 = sshll.u32 %s562_s5, 4  ;;  %s40_s8 = int_to_ptr.hbm [resolvable:$true] %s39_s8 }
   0x3   :  { %s26_s28 = sshll.u32 %s480_s27, 4  ;;  %s481_s9 = smov 64   ;;  %s27_s28 = int_to_ptr.vmem [resolvable:$true] %s26_s28 }
   0x4   :  { %s482_s10 = smov 4   ;;  %s483_s11 = smov [#allocation4]  }
   0x5   :  { %32 = dma.hbm_to_vmem [thread:$0]  %s25_s26, 1024, %s27_s28, [#allocation3], %s481_s9, %s481_s9, %s482_s10  }
   0x6   :  { %s41_s12 = sshll.u32 %s483_s11, 4  ;;  %s42_s12 = int_to_ptr.vmem [resolvable:$true] %s41_s12 }
   0x7   :  { %47 = dma.hbm_to_vmem [thread:$0]  %s40_s8, 1024, %s42_s12, [#allocation5], %s481_s9, %s481_s9, %s482_s10  }
   0x8   :  { %476 = dma.done.wait [#allocation3], 1024  }
   0x9   :  { %477 = vsyncadd [#allocation3], 4294966272 }
   0xa   :  { %478 = dma.done.wait [#allocation5], 1024  }
   0xb   :  { %479 = vsyncadd [#allocation5], 4294966272  ;;  %v396_v0 = vld [vmem:[%s558_s1 + $0x8] sm:$0xff]  ;;  %v395_v1 = vld [vmem:[%s558_s1] sm:$0xff]  ;;  %vm82_vm0 = vcmask 261120  }
   0xc   :  { %v404_v2 = vld [vmem:[#allocation2 + $0x38] sm:$0xff]  ;;  %92 = vmatpush.bf16.msra.mxu0 %v396_v0  ;;  %v59_v3 = vld [vmem:[%s557_s0] sm:$0xff]  ;;  %v60_v4 = vld [vmem:[%s557_s0 + $0x8] sm:$0xff] }
   0xd   :  { %171 = vmatpush.bf16.msra.mxu1 %v404_v2  ;;  %v403_v5 = vld [vmem:[#allocation2 + $0x30] sm:$0xff]  ;;  %v61_v6 = vpack.c.bf16 %v60_v4, %v59_v3  ;;  %v402_v7 = vld [vmem:[#allocation2 + $0x28] sm:$0xff]  ;;  %v401_v8 = vld [vmem:[#allocation2 + $0x20] sm:$0xff] }
   0xe   :  { %v400_v9 = vld [vmem:[#allocation2 + $0x18] sm:$0xff]  ;;  %v399_v10 = vld [vmem:[#allocation2 + $0x10] sm:$0xff]  ;;  %v398_v11 = vld [vmem:[#allocation2 + $0x8] sm:$0xff] }
   0xf   :  { %v397_v12 = vld [vmem:[#allocation2] sm:$0xff]  ;;  %v412_v13 = vld [vmem:[#allocation4 + $0x38] sm:$0xff]  ;;  %v411_v14 = vld [vmem:[#allocation4 + $0x30] sm:$0xff] }
  0x10   :  { %93 = vmatpush.bf16.msra.mxu0 %v395_v1  ;;  %256 = vmatpush.bf16.msra.mxu2 %v412_v13  ;;  %v410_v15 = vld [vmem:[#allocation4 + $0x28] sm:$0xff]  ;;  %v409_v16 = vld [vmem:[#allocation4 + $0x20] sm:$0xff]  ;;  %v408_v25 = vld [vmem:[#allocation4 + $0x18] sm:$0xff] }
  0x11   :  { %172 = vmatpush.bf16.msra.mxu1 %v403_v5  ;;  %v417_v18 = vld [vmem:[%s559_s2] ss:$0 sm:$0xff]  ;;  %v407_v26 = vld [vmem:[#allocation4 + $0x10] sm:$0xff]  ;;  %v406_v27 = vld [vmem:[#allocation4 + $0x8] sm:$0xff] }
  0x12   :  { %v405_v28 = vld [vmem:[#allocation4] sm:$0xff] }
  0x13   :  { %330 = vmatmul.msk.bf16.vlgmr.msra.gmra.mxu0 %vm82_vm0, %v61_v6  ;;  %v418_v30 = vld [vmem:[%s561_s4] ss:$0 sm:$0xff] }
  0x14   :  { %257 = vmatpush.bf16.msra.mxu2 %v411_v14  ;;  %v419_v37 = vld [vmem:[%s563_s6] ss:$0 sm:$0xff] }
  0x15   :  { %173 = vmatpush.bf16.msra.mxu1 %v402_v7 }
  0x18   :  { %258 = vmatpush.bf16.msra.mxu2 %v410_v15 }
  0x19   :  { %174 = vmatpush.bf16.msra.mxu1 %v401_v8 }
  0x1c   :  { %259 = vmatpush.bf16.msra.mxu2 %v409_v16 }
  0x1d   :  { %175 = vmatpush.bf16.msra.mxu1 %v400_v9 }
  0x20   :  { %260 = vmatpush.bf16.msra.mxu2 %v408_v25 }
  0x21   :  { %176 = vmatpush.bf16.msra.mxu1 %v399_v10 }
  0x24   :  { %261 = vmatpush.bf16.msra.mxu2 %v407_v26 }
  0x25   :  { %177 = vmatpush.bf16.msra.mxu1 %v398_v11 }
  0x28   :  { %262 = vmatpush.bf16.msra.mxu2 %v406_v27 }
  0x29   :  { %178 = vmatpush.bf16.msra.mxu1 %v397_v12 }
  0x2c   :  { %263 = vmatpush.bf16.msra.mxu2 %v405_v28 }
  0x90   :  { %v95_v17 = vpop.f32.mrf.mxu0 }
  0x91   :  { %v96_v19 = vadd.f32 %v417_v18, %v95_v17 }
  0x93   :  { %v100_v22 = vmax.f32 %v96_v19, 0.0 }
  0x98   :  { %v97_v20 = vpop.f32.mrf.mxu0 }
  0x99   :  { %v98_v21 = vadd.f32 %v417_v18, %v97_v20 }
  0x9b   :  { %v101_v23 = vmax.f32 %v98_v21, 0.0 }
  0x9d   :  { %v102_v24 = vpack.c.bf16 %v101_v23, %v100_v22 }
  0x9f   :  { %179 = vmatmul.bf16.vlgmr.msra.gmra.mxu1 %v102_v24 }
 0x11c   :  { %v180_v29 = vpop.f32.mrf.mxu1 }
 0x11d   :  { %v181_v31 = vadd.f32 %v418_v30, %v180_v29 }
 0x11f   :  { %v185_v34 = vmax.f32 %v181_v31, 0.0 }
 0x124   :  { %v182_v32 = vpop.f32.mrf.mxu1 }
 0x125   :  { %v183_v33 = vadd.f32 %v418_v30, %v182_v32 }
 0x127   :  { %v186_v35 = vmax.f32 %v183_v33, 0.0 }
 0x129   :  { %v187_v36 = vpack.c.bf16 %v186_v35, %v185_v34 }
 0x12b   :  { %264 = vmatmul.bf16.vlgmr.msra.gmra.mxu2 %v187_v36 }
 0x1ae   :  { %v265_v38 = vpop.f32.mrf.mxu2 }
 0x1af   :  { %v266_v39 = vadd.f32 %v419_v37, %v265_v38 }
 0x1b1   :  { %270 = vmax.xlane.f32.xlu0 %v266_v39 }
 0x1b6   :  { %v267_v40 = vpop.f32.mrf.mxu2 }
 0x1b7   :  { %v268_v41 = vadd.f32 %v419_v37, %v267_v40 }
 0x1b9   :  { %272 = vmax.xlane.f32.xlu0 %v268_v41 }
 0x224   :  { %v271_v42 = vpop.xlane.xlu0 %270 }
 0x225   :  { %v274_v43 = vsub.f32 %v266_v39, %v271_v42 }
 0x227   :  { %v276_v44 = vmul.f32 1.442695, %v274_v43 }
 0x229   :  { %420 = vpow2.f32 %v276_v44 }
 0x22c   :  { %v273_v45 = vpop.xlane.xlu0 %272 }
 0x22d   :  { %v275_v46 = vsub.f32 %v268_v41, %v273_v45 }
 0x22f   :  { %v421_v47 = vpop.eup %420  ;;  %v278_v48 = vmul.f32 1.442695, %v275_v46 }
 0x230   :  { %280 = vadd.xlane.f32.xlu1 %v421_v47 }
 0x231   :  { %422 = vpow2.f32 %v278_v48 }
 0x237   :  { %v423_v49 = vpop.eup %422 }
 0x238   :  { %282 = vadd.xlane.f32.xlu1 %v423_v49 }
 0x2a3   :  { %v281_v50 = vpop.xlane.xlu1 %280 }
 0x2a4   :  { %424 = vrcp.f32 %v281_v50  ;;  %v295_v55 = vand.u32 2147483648, %v281_v50  ;;  %v293_v57 = vand.u32 2147483647, %v281_v50  ;;  %vm289_vm2 = vweird.f32 %v281_v50 }
 0x2a6   :  { %v296_v60 = vor.u32 1.1754944e-38, %v295_v55  ;;  %vm294_vm4 = vcmp.eq.f32.partialorder %v293_v57, 8.507059e+37 }
 0x2aa   :  { %v425_v51 = vpop.eup %424 }
 0x2ab   :  { %v285_v52 = vmul.f32 %v425_v51, %v281_v50  ;;  %v283_v53 = vpop.xlane.xlu1 %282  ;;  %vm290_vm1 = vweird.f32 %v425_v51 }
 0x2ac   :  { %426 = vrcp.f32 %v283_v53  ;;  %vm291_vm3 = vmor %vm289_vm2, %vm290_vm1  ;;  %v310_v2 = vand.u32 2147483648, %v283_v53  ;;  %v308_v4 = vand.u32 2147483647, %v283_v53  ;;  %vm304_vm6 = vweird.f32 %v283_v53 }
 0x2ad   :  { %v286_v54 = vsub.f32 1.0, %v285_v52 }
 0x2ae   :  { %v311_v6 = vor.u32 1.1754944e-38, %v310_v2  ;;  %vm309_vm8 = vcmp.eq.f32.partialorder %v308_v4, 8.507059e+37 }
 0x2af   :  { %v287_v56 = vmul.f32 %v425_v51, %v286_v54 }
 0x2b1   :  { %v288_v58 = vadd.f32 %v425_v51, %v287_v56 }
 0x2b2   :  { %v427_v59 = vpop.eup %426 }
 0x2b3   :  { %v292_v61 = vsel %vm291_vm3, %v425_v51, %v288_v58  ;;  %v300_v62 = vmul.f32 %v427_v59, %v283_v53  ;;  %vm305_vm5 = vweird.f32 %v427_v59 }
 0x2b4   :  { %v297_v63 = vsel %vm294_vm4, %v296_v60, %v292_v61  ;;  %vm306_vm7 = vmor %vm304_vm6, %vm305_vm5 }
 0x2b5   :  { %v298_v0 = vmul.f32 %v421_v47, %v297_v63  ;;  %v301_v1 = vsub.f32 1.0, %v300_v62 }
 0x2b7   :  { %314 = vst [vmem:[%s564_s7] sm:$0xff] %v298_v0  ;;  %v302_v3 = vmul.f32 %v427_v59, %v301_v1 }
 0x2b9   :  { %v303_v5 = vadd.f32 %v427_v59, %v302_v3 }
 0x2bb   :  { %v307_v7 = vsel %vm306_vm7, %v427_v59, %v303_v5 }
 0x2bc   :  { %v312_v8 = vsel %vm309_vm8, %v311_v6, %v307_v7 }
 0x2bd   :  { %v313_v9 = vmul.f32 %v423_v49, %v312_v8 }
 0x2bf   :  { %315 = vst [vmem:[%s564_s7 + $0x8] sm:$0xff] %v313_v9 }
 0x2c0   :  { %320 = vsyncpa [#allocation3], 1 }
 0x2c1   :  { %321 = vsyncpa [#allocation5], 1 }

</bundles_post_ra>
